<compile_context>
chip_gen: v7x
topology: tpu7x:2x2x1
jax: 0.10.0
libtpu: 0.0.40
codegen_flags: <defaults>
</compile_context>

<pallas_src>
import jax
import jax.numpy as jnp
from jax import lax
from jax.experimental import pallas as pl
from jax.experimental.pallas import tpu as pltpu


# ----------------------------------------------------------------------------
# Kernel: one grid step == (batch b, query tile qi, head h)
# ----------------------------------------------------------------------------
def _attention_kernel(xq_ref, xkv_ref, wq_ref, wk_ref, wv_ref, wo_ref, bo_ref,
                      o_ref, acc_ref):
    # Block shapes:
    #   xq_ref  : (1, TQ, DIM)  bf16   query rows of this tile
    #   xkv_ref : (1, N,  DIM)  bf16   full sequence (source of K/V)
    #   wq_ref  : (1, DIM, D)   bf16   per-head Q projection (scale pre-folded)
    #   wk_ref  : (1, DIM, D)   bf16   per-head K projection
    #   wv_ref  : (1, DIM, D)   bf16   per-head V projection
    #   wo_ref  : (1, D, DIM)   bf16   per-head rows of the output projection
    #   bo_ref  : (1, DIM)      f32    output bias
    #   o_ref   : (1, TQ, DIM)  f32    resident across the head axis
    #   acc_ref : (TQ, DIM)     f32    VMEM accumulator
    h = pl.program_id(2)

    @pl.when(h == 0)
    def _():
        acc_ref[...] = jnp.zeros_like(acc_ref)

    xq = xq_ref[0]                    # (TQ, DIM) bf16
    xkv = xkv_ref[0]                  # (N, DIM)  bf16

    # Per-head projections (MXU, bf16 operands, f32 accumulation).
    # The softmax scale is already folded into wq.
    q = jnp.dot(xq, wq_ref[0], preferred_element_type=jnp.float32).astype(jnp.bfloat16)
    k = jnp.dot(xkv, wk_ref[0], preferred_element_type=jnp.float32).astype(jnp.bfloat16)
    v = jnp.dot(xkv, wv_ref[0], preferred_element_type=jnp.float32).astype(jnp.bfloat16)

    # scores = q @ k^T without materializing a transpose.
    s = lax.dot_general(q, k, (((1,), (1,)), ((), ())),
                        preferred_element_type=jnp.float32)         # (TQ, N)

    # Numerically stable softmax, all in f32; approx reciprocal -> EUP slot.
    m = jnp.max(s, axis=-1, keepdims=True)
    p = jnp.exp(s - m)
    attn = (p * pl.reciprocal(jnp.sum(p, axis=-1, keepdims=True), approx=True)
            ).astype(jnp.bfloat16)

    o_h = jnp.dot(attn, v, preferred_element_type=jnp.float32)      # (TQ, D)

    # 'b h n d -> b n (h d)' + to_out Linear, fused:
    #   concat_h(o_h) @ W_out == sum_h o_h @ W_out[h*d:(h+1)*d, :]
    acc_ref[...] += jnp.dot(o_h.astype(jnp.bfloat16), wo_ref[0],
                            preferred_element_type=jnp.float32)

    @pl.when(h == pl.num_programs(2) - 1)
    def _():
        o_ref[0] = (acc_ref[...] + bo_ref[...]).astype(o_ref.dtype)


# ----------------------------------------------------------------------------
# One-time parameter layout / dtype transform (done outside the kernel)
# ----------------------------------------------------------------------------
def prepare_params(params, heads):
    w_qkv = params["w_qkv"]                       # (dim, 3 * inner_dim)
    w_out = params["w_out"]                       # (inner_dim, dim)
    b_out = params["b_out"]                       # (dim,)
    dim = w_qkv.shape[0]
    inner_dim = w_qkv.shape[1] // 3
    d = inner_dim // heads
    scale = d ** -0.5

    wq, wk, wv = jnp.split(w_qkv, 3, axis=1)      # each (dim, inner_dim)

    def to_heads(w):                              # (dim, inner) -> (heads, dim, d)
        return jnp.transpose(w.reshape(dim, heads, d), (1, 0, 2))

    return {
        "wq": (to_heads(wq) * scale).astype(jnp.bfloat16),   # scale folded in
        "wk": to_heads(wk).astype(jnp.bfloat16),
        "wv": to_heads(wv).astype(jnp.bfloat16),
        "wo": w_out.reshape(heads, d, dim).astype(jnp.bfloat16),
        "bo": b_out.reshape(1, dim).astype(jnp.float32),
    }


def _estimate_vmem_bytes(n, tq, dim, d):
    bf, f32 = 2, 4
    # double-buffered input/output blocks
    blocks = (tq * dim * bf + n * dim * bf + 3 * dim * d * bf
              + d * dim * bf + dim * f32 + tq * dim * f32)
    # scratch accumulator + in-kernel temporaries (scores, exp, q/k/v)
    temps = tq * dim * f32 + 2 * tq * n * f32 + (tq + 2 * n) * d * f32
    return 2 * blocks + temps


# ----------------------------------------------------------------------------
# Module-equivalent forward (single pallas_call)
# ----------------------------------------------------------------------------
def attention_forward(x, prepared):
    """x: (B, N, DIM) float32. Mirrors Attention.forward (eval, dropout=0)."""
    b, n, dim = x.shape
    heads, _, d = prepared["wq"].shape

    # Query-tile axis: keeps both v7x TensorCores busy even for B == 1 and
    # bounds the per-step (TQ, N) score block. Falls back to one tile when N
    # is not a multiple of 128 (demo shapes).
    tq = 128 if (n % 128 == 0) else n
    nq = n // tq

    x_bf = x.astype(jnp.bfloat16)

    vmem_limit = int(min(64 * 2 ** 20,
                         max(32 * 2 ** 20,
                             2 * _estimate_vmem_bytes(n, tq, dim, d))))

    # TODO(synk): for very large N (>~2k) tile the KV axis flash-style
    # (running max / denominator in VMEM scratch) instead of the full (TQ, N)
    # f32 score block, which is what stops fitting first on v7x's 64 MiB VMEM.
    return pl.pallas_call(
        _attention_kernel,
        out_shape=jax.ShapeDtypeStruct((b, n, dim), jnp.float32),
        grid=(b, nq, heads),
        in_specs=[
            pl.BlockSpec((1, tq, dim), lambda bi, qi, hi: (bi, qi, 0)),  # x (Q rows)
            pl.BlockSpec((1, n, dim), lambda bi, qi, hi: (bi, 0, 0)),    # x (K/V rows)
            pl.BlockSpec((1, dim, d), lambda bi, qi, hi: (hi, 0, 0)),    # Wq head slab
            pl.BlockSpec((1, dim, d), lambda bi, qi, hi: (hi, 0, 0)),    # Wk head slab
            pl.BlockSpec((1, dim, d), lambda bi, qi, hi: (hi, 0, 0)),    # Wv head slab
            pl.BlockSpec((1, d, dim), lambda bi, qi, hi: (hi, 0, 0)),    # Wout head rows
            pl.BlockSpec((1, dim), lambda bi, qi, hi: (0, 0)),           # bias
        ],
        out_specs=pl.BlockSpec((1, tq, dim), lambda bi, qi, hi: (bi, qi, 0)),
        scratch_shapes=[pltpu.VMEM((tq, dim), jnp.float32)],
        compiler_params=pltpu.CompilerParams(
            dimension_semantics=("parallel", "parallel", "arbitrary"),
            vmem_limit_bytes=vmem_limit),
    )(x_bf, x_bf, prepared["wq"], prepared["wk"], prepared["wv"],
      prepared["wo"], prepared["bo"])


def init_params(key, dim, heads, dim_head):
    inner_dim = heads * dim_head
    k1, k2, k3 = jax.random.split(key, 3)
    w_qkv = jax.random.normal(k1, (dim, inner_dim * 3), jnp.float32) * 0.02
    w_out = jax.random.normal(k2, (inner_dim, dim), jnp.float32) * 0.02
    b_out = jax.random.normal(k3, (dim,), jnp.float32) * 0.02
    return {"w_qkv": w_qkv, "w_out": w_out, "b_out": b_out}


# ----------------------------------------------------------------------------
# Pure-JAX (f32) reference for validation
# ----------------------------------------------------------------------------
def reference_forward(x, params, heads):
    b, n, dim = x.shape
    inner_dim = params["w_qkv"].shape[1] // 3
    dim_head = inner_dim // heads
    scale = dim_head ** -0.5
    qkv = x @ params["w_qkv"]
    q, k, v = jnp.split(qkv, 3, axis=-1)

    def to_heads(t):
        return jnp.transpose(t.reshape(b, n, heads, dim_head), (0, 2, 1, 3))

    q, k, v = map(to_heads, (q, k, v))
    dots = jnp.einsum("bhid,bhjd->bhij", q, k) * scale
    attn = jax.nn.softmax(dots, axis=-1)
    out = jnp.einsum("bhij,bhjd->bhid", attn, v)
    out = jnp.transpose(out, (0, 2, 1, 3)).reshape(b, n, inner_dim)
    return out @ params["w_out"] + params["b_out"]


if __name__ == "__main__":
    # Small shapes consistent with the module: batch=2, seq=8, dim=32,
    # heads=4, dim_head=16 -> inner_dim=64, project_out=True.
    B, N, DIM = 2, 8, 32
    HEADS, DIM_HEAD = 4, 16

    key = jax.random.PRNGKey(0)
    kx, kp = jax.random.split(key)
    x = jax.random.normal(kx, (B, N, DIM), jnp.float32)
    params = init_params(kp, DIM, HEADS, DIM_HEAD)
    prepared = prepare_params(params, HEADS)

    out = attention_forward(x, prepared)
    out = jax.block_until_ready(out)

    ref = reference_forward(x, params, HEADS)
    assert out.shape == (B, N, DIM)
    # bf16 MXU operands + approx reciprocal -> loosen tolerance vs f32 reference
    assert jnp.allclose(out, ref, atol=2e-2, rtol=2e-2), "mismatch vs reference"

    print("KERNEL_OK")
</pallas_src>

<mosaic_0001>
module attributes {stable_mosaic.version = 11 : i64} {
  func.func @_attention_kernel(%arg0: i32, %arg1: i32, %arg2: i32, %arg3: memref<1x8x32xbf16, #tpu.memory_space<vmem>>, %arg4: memref<1x8x32xbf16, #tpu.memory_space<vmem>>, %arg5: memref<1x32x16xbf16, #tpu.memory_space<vmem>>, %arg6: memref<1x32x16xbf16, #tpu.memory_space<vmem>>, %arg7: memref<1x32x16xbf16, #tpu.memory_space<vmem>>, %arg8: memref<1x16x32xbf16, #tpu.memory_space<vmem>>, %arg9: memref<1x32xf32, #tpu.memory_space<vmem>>, %arg10: memref<1x8x32xf32, #tpu.memory_space<vmem>>, %arg11: memref<8x32xf32, #tpu.memory_space<vmem>>) attributes {dimension_semantics = [#tpu.dimension_semantics<parallel>, #tpu.dimension_semantics<parallel>, #tpu.dimension_semantics<arbitrary>], iteration_bounds = array<i64: 2, 1, 4>, scalar_prefetch = 0 : i64, scratch_operands = 1 : i64, tpu.core_type = #tpu.core_type<tc>, window_params = [{transform_indices = @transform_0, window_bounds = array<i64: 1, 8, 32>}, {transform_indices = @transform_1, window_bounds = array<i64: 1, 8, 32>}, {transform_indices = @transform_2, window_bounds = array<i64: 1, 32, 16>}, {transform_indices = @transform_3, window_bounds = array<i64: 1, 32, 16>}, {transform_indices = @transform_4, window_bounds = array<i64: 1, 32, 16>}, {transform_indices = @transform_5, window_bounds = array<i64: 1, 16, 32>}, {pipeline_mode = #tpu.pipeline_mode<synchronous>, transform_indices = @transform_6, window_bounds = array<i64: 1, 32>}, {transform_indices = @transform_7, window_bounds = array<i64: 1, 8, 32>}]} {
    %c0_i32 = arith.constant 0 : i32
    %0 = arith.cmpi eq, %arg2, %c0_i32 : i32
    %1 = arith.extui %0 : i1 to i32
    %c0_i32_0 = arith.constant 0 : i32
    %2 = arith.cmpi ne, %1, %c0_i32_0 : i32
    scf.if %2 {
      %cst_30 = arith.constant 0.000000e+00 : f32
      %42 = vector.broadcast %cst_30 : f32 to vector<8x32xf32>
      %c0_31 = arith.constant 0 : index
      %c0_32 = arith.constant 0 : index
      %43 = vector.load %arg11[%c0_31, %c0_32] : memref<8x32xf32, #tpu.memory_space<vmem>>, vector<8x32xf32>
      tpu.vector_store %arg11[%c0_31, %c0_32], %42 {strides = array<i32>} : memref<8x32xf32, #tpu.memory_space<vmem>>, vector<8x32xf32>,
    } else {
    }
    %c0 = arith.constant 0 : index
    %c0_1 = arith.constant 0 : index
    %c0_2 = arith.constant 0 : index
    %3 = vector.load %arg3[%c0, %c0_1, %c0_2] : memref<1x8x32xbf16, #tpu.memory_space<vmem>>, vector<1x8x32xbf16>
    %4 = vector.shape_cast %3 : vector<1x8x32xbf16> to vector<8x32xbf16>
    %c0_3 = arith.constant 0 : index
    %c0_4 = arith.constant 0 : index
    %c0_5 = arith.constant 0 : index
    %5 = vector.load %arg4[%c0_3, %c0_4, %c0_5] : memref<1x8x32xbf16, #tpu.memory_space<vmem>>, vector<1x8x32xbf16>
    %6 = vector.shape_cast %5 : vector<1x8x32xbf16> to vector<8x32xbf16>
    %c0_6 = arith.constant 0 : index
    %c0_7 = arith.constant 0 : index
    %c0_8 = arith.constant 0 : index
    %7 = vector.load %arg5[%c0_6, %c0_7, %c0_8] : memref<1x32x16xbf16, #tpu.memory_space<vmem>>, vector<1x32x16xbf16>
    %8 = vector.shape_cast %7 : vector<1x32x16xbf16> to vector<32x16xbf16>
    %cst = arith.constant dense<0.000000e+00> : vector<8x16xf32>
    %9 = tpu.matmul %4, %8, %cst {dimension_numbers = #tpu.dot_dimension_numbers<[1], [0], [0], [1], [0, 0, 1, 1], [], []>} : vector<8x32xbf16>, vector<32x16xbf16>, vector<8x16xf32> -> vector<8x16xf32>
    %10 = arith.truncf %9 : vector<8x16xf32> to vector<8x16xbf16>
    %c0_9 = arith.constant 0 : index
    %c0_10 = arith.constant 0 : index
    %c0_11 = arith.constant 0 : index
    %11 = vector.load %arg6[%c0_9, %c0_10, %c0_11] : memref<1x32x16xbf16, #tpu.memory_space<vmem>>, vector<1x32x16xbf16>
    %12 = vector.shape_cast %11 : vector<1x32x16xbf16> to vector<32x16xbf16>
    %cst_12 = arith.constant dense<0.000000e+00> : vector<8x16xf32>
    %13 = tpu.matmul %6, %12, %cst_12 {dimension_numbers = #tpu.dot_dimension_numbers<[1], [0], [0], [1], [0, 0, 1, 1], [], []>} : vector<8x32xbf16>, vector<32x16xbf16>, vector<8x16xf32> -> vector<8x16xf32>
    %14 = arith.truncf %13 : vector<8x16xf32> to vector<8x16xbf16>
    %c0_13 = arith.constant 0 : index
    %c0_14 = arith.constant 0 : index
    %c0_15 = arith.constant 0 : index
    %15 = vector.load %arg7[%c0_13, %c0_14, %c0_15] : memref<1x32x16xbf16, #tpu.memory_space<vmem>>, vector<1x32x16xbf16>
    %16 = vector.shape_cast %15 : vector<1x32x16xbf16> to vector<32x16xbf16>
    %cst_16 = arith.constant dense<0.000000e+00> : vector<8x16xf32>
    %17 = tpu.matmul %6, %16, %cst_16 {dimension_numbers = #tpu.dot_dimension_numbers<[1], [0], [0], [1], [0, 0, 1, 1], [], []>} : vector<8x32xbf16>, vector<32x16xbf16>, vector<8x16xf32> -> vector<8x16xf32>
    %18 = arith.truncf %17 : vector<8x16xf32> to vector<8x16xbf16>
    %cst_17 = arith.constant dense<0.000000e+00> : vector<8x8xf32>
    %19 = tpu.matmul %10, %14, %cst_17 {dimension_numbers = #tpu.dot_dimension_numbers<[1], [1], [0], [0], [0, 0, 1, 0], [], []>} : vector<8x16xbf16>, vector<8x16xbf16>, vector<8x8xf32> -> vector<8x8xf32>
    %cst_18 = arith.constant dense<0xFF800000> : vector<8xf32>
    %20 = vector.multi_reduction <maximumf>, %19, %cst_18 [1] : vector<8x8xf32> to vector<8xf32>
    %21 = vector.shape_cast %20 : vector<8xf32> to vector<8x1xf32>
    %22 = vector.broadcast %21 : vector<8x1xf32> to vector<8x8xf32>
    %23 = arith.subf %19, %22 : vector<8x8xf32>
    %24 = math.exp %23 : vector<8x8xf32>
    %cst_19 = arith.constant dense<0.000000e+00> : vector<8xf32>
    %25 = vector.multi_reduction <add>, %24, %cst_19 [1] : vector<8x8xf32> to vector<8xf32>
    %26 = vector.shape_cast %25 : vector<8xf32> to vector<8x1xf32>
    %27 = tpu.reciprocal %26 {approx = true} : vector<8x1xf32> -> vector<8x1xf32>
    %28 = vector.broadcast %27 : vector<8x1xf32> to vector<8x8xf32>
    %29 = arith.mulf %24, %28 : vector<8x8xf32>
    %30 = arith.truncf %29 : vector<8x8xf32> to vector<8x8xbf16>
    %cst_20 = arith.constant dense<0.000000e+00> : vector<8x16xf32>
    %31 = tpu.matmul %30, %18, %cst_20 {dimension_numbers = #tpu.dot_dimension_numbers<[1], [0], [0], [1], [0, 0, 1, 1], [], []>} : vector<8x8xbf16>, vector<8x16xbf16>, vector<8x16xf32> -> vector<8x16xf32>
    %c0_21 = arith.constant 0 : index
    %c0_22 = arith.constant 0 : index
    %32 = vector.load %arg11[%c0_21, %c0_22] : memref<8x32xf32, #tpu.memory_space<vmem>>, vector<8x32xf32>
    %33 = arith.truncf %31 : vector<8x16xf32> to vector<8x16xbf16>
    %c0_23 = arith.constant 0 : index
    %c0_24 = arith.constant 0 : index
    %c0_25 = arith.constant 0 : index
    %34 = vector.load %arg8[%c0_23, %c0_24, %c0_25] : memref<1x16x32xbf16, #tpu.memory_space<vmem>>, vector<1x16x32xbf16>
    %35 = vector.shape_cast %34 : vector<1x16x32xbf16> to vector<16x32xbf16>
    %cst_26 = arith.constant dense<0.000000e+00> : vector<8x32xf32>
    %36 = tpu.matmul %33, %35, %cst_26 {dimension_numbers = #tpu.dot_dimension_numbers<[1], [0], [0], [1], [0, 0, 1, 1], [], []>} : vector<8x16xbf16>, vector<16x32xbf16>, vector<8x32xf32> -> vector<8x32xf32>
    %37 = arith.addf %32, %36 : vector<8x32xf32>
    %c0_27 = arith.constant 0 : index
    %c0_28 = arith.constant 0 : index
    %38 = vector.load %arg11[%c0_27, %c0_28] : memref<8x32xf32, #tpu.memory_space<vmem>>, vector<8x32xf32>
    tpu.vector_store %arg11[%c0_27, %c0_28], %37 {strides = array<i32>} : memref<8x32xf32, #tpu.memory_space<vmem>>, vector<8x32xf32>,
    %c3_i32 = arith.constant 3 : i32
    %39 = arith.cmpi eq, %arg2, %c3_i32 : i32
    %40 = arith.extui %39 : i1 to i32
    %c0_i32_29 = arith.constant 0 : i32
    %41 = arith.cmpi ne, %40, %c0_i32_29 : i32
    scf.if %41 {
      %c0_30 = arith.constant 0 : index
      %c0_31 = arith.constant 0 : index
      %42 = vector.load %arg11[%c0_30, %c0_31] : memref<8x32xf32, #tpu.memory_space<vmem>>, vector<8x32xf32>
      %c0_32 = arith.constant 0 : index
      %c0_33 = arith.constant 0 : index
      %43 = vector.load %arg9[%c0_32, %c0_33] : memref<1x32xf32, #tpu.memory_space<vmem>>, vector<1x32xf32>
      %44 = vector.broadcast %43 : vector<1x32xf32> to vector<8x32xf32>
      %45 = arith.addf %42, %44 : vector<8x32xf32>
      %c0_34 = arith.constant 0 : index
      %c0_35 = arith.constant 0 : index
      %c0_36 = arith.constant 0 : index
      %46 = vector.load %arg10[%c0_34, %c0_35, %c0_36] : memref<1x8x32xf32, #tpu.memory_space<vmem>>, vector<1x8x32xf32>
      %47 = vector.shape_cast %46 : vector<1x8x32xf32> to vector<8x32xf32>
      %48 = vector.shape_cast %45 : vector<8x32xf32> to vector<1x8x32xf32>
      tpu.vector_store %arg10[%c0_34, %c0_35, %c0_36], %48 {strides = array<i32>} : memref<1x8x32xf32, #tpu.memory_space<vmem>>, vector<1x8x32xf32>,
    } else {
    }
    return
  }
  func.func @transform_0(%arg0: i32, %arg1: i32, %arg2: i32) -> (i32, i32, i32) {
    %c0_i32 = arith.constant 0 : i32
    %c0_i32_0 = arith.constant 0 : i32
    return %arg0, %arg1, %c0_i32 : i32, i32, i32
  }
  func.func @transform_1(%arg0: i32, %arg1: i32, %arg2: i32) -> (i32, i32, i32) {
    %c0_i32 = arith.constant 0 : i32
    %c0_i32_0 = arith.constant 0 : i32
    %c0_i32_1 = arith.constant 0 : i32
    return %arg0, %c0_i32, %c0_i32_0 : i32, i32, i32
  }
  func.func @transform_2(%arg0: i32, %arg1: i32, %arg2: i32) -> (i32, i32, i32) {
    %c0_i32 = arith.constant 0 : i32
    %c0_i32_0 = arith.constant 0 : i32
    %c0_i32_1 = arith.constant 0 : i32
    return %arg2, %c0_i32, %c0_i32_0 : i32, i32, i32
  }
  func.func @transform_3(%arg0: i32, %arg1: i32, %arg2: i32) -> (i32, i32, i32) {
    %c0_i32 = arith.constant 0 : i32
    %c0_i32_0 = arith.constant 0 : i32
    %c0_i32_1 = arith.constant 0 : i32
    return %arg2, %c0_i32, %c0_i32_0 : i32, i32, i32
  }
  func.func @transform_4(%arg0: i32, %arg1: i32, %arg2: i32) -> (i32, i32, i32) {
    %c0_i32 = arith.constant 0 : i32
    %c0_i32_0 = arith.constant 0 : i32
    %c0_i32_1 = arith.constant 0 : i32
    return %arg2, %c0_i32, %c0_i32_0 : i32, i32, i32
  }
  func.func @transform_5(%arg0: i32, %arg1: i32, %arg2: i32) -> (i32, i32, i32) {
    %c0_i32 = arith.constant 0 : i32
    %c0_i32_0 = arith.constant 0 : i32
    %c0_i32_1 = arith.constant 0 : i32
    return %arg2, %c0_i32, %c0_i32_0 : i32, i32, i32
  }
  func.func @transform_6(%arg0: i32, %arg1: i32, %arg2: i32) -> (i32, i32) {
    %c0_i32 = arith.constant 0 : i32
    %c0_i32_0 = arith.constant 0 : i32
    %c0_i32_1 = arith.constant 0 : i32
    return %c0_i32, %c0_i32_0 : i32, i32
  }
  func.func @transform_7(%arg0: i32, %arg1: i32, %arg2: i32) -> (i32, i32, i32) {
    %c0_i32 = arith.constant 0 : i32
    %c0_i32_0 = arith.constant 0 : i32
    return %arg0, %arg1, %c0_i32 : i32, i32, i32
  }
}

</mosaic_0001>

<bundles_post_ra>
// kernel: tpu_custom_call.1
= control target key start
LH: loop header
LB: loop body
LE: loop exit
PB: predicated region body
PF: predicated region fallthrough
CT: control target
= control target key end

     0   :  { %s1426_s0 = inlined_call_operand.vmem [shape: bf16[2,8,32], index: 0, kind: input, shape index: {}]   ;;  %s1427_s1 = inlined_call_operand.vmem [shape: bf16[2,8,32], index: 1, kind: input, shape index: {}]   ;;  %s1428_s2 = inlined_call_operand.vmem [shape: bf16[4,32,16], index: 2, kind: input, shape index: {}]   ;;  %s1429_s3 = inlined_call_operand.vmem [shape: bf16[4,32,16], index: 3, kind: input, shape index: {}]   ;;  %s1430_s4 = inlined_call_operand.vmem [shape: bf16[4,32,16], index: 4, kind: input, shape index: {}]   ;;  %s1431_s5 = inlined_call_operand.vmem [shape: bf16[4,16,32], index: 5, kind: input, shape index: {}]   ;;  %s1432_s6 = inlined_call_operand.vmem [shape: f32[1,32], index: 6, kind: input, shape index: {}]   ;;  %s1433_s7 = inlined_call_operand.hbm [shape: f32[2,8,32], index: 7, kind: output, shape index: {}]  }
   0x1   :  { %1443 = sst [smem:[#allocation15_spill]] %s1426_s0 }
   0x2   :  { %12 = vsyncpa [#allocation4], 0 }
   0x3   :  { %14 = vsyncpa [#allocation4 + $0x1], 0  ;;  %s1240_s24 = smov 0   ;;  %s1242_s25 = smov 0  }
   0x4   :  { %s1244_s26 = smov 0   ;;  %s1246_s27 = smov 0  }
   0x5   :  { %s1248_s28 = smov 0   ;;  %s1250_s29 = smov 0  }
   0x6   :  { %s1252_s30 = smov 0   ;;  %s1254_s8 = smov 0  }
   0x7 LB: > { %1444 = sst [smem:[#allocation6_spill]] %s1166_s24  ;;  %s918_s9 = sadd.s32 4294967295, %s1194_s8   ;;  %s1194_s8 = sphi %s1254_s8, %s20_s8   ;;  %s1190_s30 = sphi %s1252_s30, %s1465_s30   ;;  %s1186_s29 = sphi %s1250_s29, %s1469_s29   ;;  %s1182_s28 = sphi %s1248_s28, %s1463_s28   ;;  %s1178_s27 = sphi %s1246_s27, %s1462_s27   ;;  %s1174_s26 = sphi %s1244_s26, %s1468_s26   ;;  %s1170_s25 = sphi %s1242_s25, %s1467_s25   ;;  %s1166_s24 = sphi %s1240_s24, %s1466_s24  }
   0x8   : > { %1445 = sst [smem:[#allocation7_spill]] %s1174_s26  ;;  %s919_s10 = sadd.s32 4294967294, %s1194_s8  }
   0x9   : > { %1446 = sst [smem:[#allocation8_spill]] %s1186_s29  ;;  %s32_s11 = sadd.s32 1, %s1186_s29 }
   0xa   : > { %1447 = sst [smem:[#allocation9_spill]] %s1190_s30  ;;  %p33_p0 = scmp.ge.s32.totalorder %s32_s11, 4 }
   0xb   : > { %1448 = sst [smem:[#allocation10_spill]] %s1194_s8  ;;  %s39_s12 = sadd.s32 1, %s1190_s30 }
   0xc   : > { %p237_p1 = scmp.ne.s32.totalorder %s1174_s26, %s1170_s25  ;;  %p238_p2 = scmp.eq.s32.totalorder %s918_s9, 7 }
   0xd   : > { %s1471_s11 = smov (%p33_p0, %s32_s11), 0  ;;  %s1473_s12 = smov (!%p33_p0, %s39_s12), %s1190_s30 }
   0xe   : > { %1449 = sst [smem:[#allocation11_spill]] %s1471_s11  ;;  %p1289_p3 = por %p238_p2, %p237_p1 }
   0xf   : > { %p243_p4 = scmp.ne.s32.totalorder %s1170_s25, %s1166_s24  ;;  %p41_p5 = scmp.ge.s32.totalorder %s1473_s12, 2 }
  0x10   : > { %p244_p6 = scmp.eq.s32.totalorder %s919_s10, 7  ;;  %p922_p7 = scmp.ge.s32.totalorder %s1194_s8, 1 }
  0x11   : > { %p314_p8 = scmp.lt.s32.totalorder %s1194_s8, 9  ;;  %s1475_s12 = smov (%p41_p5, %s1473_s12), 0 }
  0x12   : > { %1451 = sst [smem:[#allocation12_spill]] %s1475_s12  ;;  %p1299_p9 = por %p244_p6, %p243_p4 }
  0x13   : > { %p315_p10 = pnand %p922_p7, %p314_p8  ;;  %s222_s15 = ssub.s32 %s1190_s30, %s1475_s12 }
  0x14   : > { %s1452_s14 = scalar_select %p1299_p9, 1, 0 }
  0x15   : > { %s227_s16 = sadd.s32 1, %s1174_s26  ;;  %p225_p11 = scmp.eq.s32.totalorder %s222_s15, 0 }
  0x16   : > { %1453 = sst [smem:[#allocation13_spill]] %s1452_s14  ;;  %318 = sbr.rel (%p315_p10) target bundleno = 1261 (0x4ed), region = 48 }
  0x17   : > { %s1307_s17 = scalar_select %p225_p11, %s1174_s26, %s227_s16  }
  0x18   : > { %s1437_s18 = sand.u32 (!%p315_p10), 1, %s1170_s25   ;;  %p372_p12 = scmp.lt.s32.totalorder (!%p315_p10), %s1182_s28, 1 }
  0x19   : > { %1454 = sst [smem:[#allocation14_spill]] %s1307_s17  ;;  %s1313_s19 = sshll.u32 (!%p315_p10), %s1437_s18, 3 }
  0x1a   : > { %p383_p13 = scmp.lt.s32.totalorder (!%p315_p10), %s1178_s27, 3  ;;  %s1455_s0 = sld [smem:[#allocation15_spill]] (!%p315_p10) }
  0x1b   : > { %p934_p0 = scmp.ne.s32.totalorder (!%p315_p10), %s1178_s27, 0 }
  0x1d   : > { %s373_s20 = scalar_select %p372_p12, %s1182_s28, 1 }
  0x1e   : > { %s384_s21 = scalar_select %p383_p13, %s1178_s27, 3 }
  0x1f   : > { %s924_s22 = sshll.u32 %s373_s20, 2  ;;  %407 = sbr.rel (%p934_p0) target bundleno = 38 (0x26), region = 52  ;;  %vm408_vm0 = vcmask (!%p934_p0), 261120   ;;  %v1196_v0 = vmov (!%p934_p0), 0.0  }
  0x20   : > { %s1321_s10 = scalar_lea.vmem %s1455_s0, %s924_s22  ;;  %s382_s12 = scalar_lea.vmem %s1427_s1, %s924_s22  ;;  %409 = vst.msk [vmem:[#allocation2] sm:$0xff] (!%p934_p0), %vm408_vm0, %v1196_v0 }
  0x21   : > { %s954_s11 = sshll.u32 %s384_s21, 4  ;;  %s957_s30 = sshll.u32 %s384_s21, 3 }
  0x22   : > { %s387_s18 = scalar_lea.vmem %s1428_s2, %s954_s11  ;;  %s392_s24 = scalar_lea.vmem %s1429_s3, %s954_s11 }
  0x23   : > { %s1335_s23 = scalar_lea.vmem %s1430_s4, %s954_s11  ;;  %s1340_s15 = scalar_lea.vmem %s1431_s5, %s957_s30 }
  0x24   : > { %s371_s22 = scalar_lea.vmem [#allocation3], %s1313_s19 }
  0x26 PF: > { %v1089_v1 = vld [vmem:[%s392_s24] sm:$0xff]   ;;  %v1197_v2 = vmov 0.0   ;;  %v1090_v3 = vld [vmem:[%s392_s24 + $0x8] sm:$0xff]   ;;  %vm1198_vm1 = vmmov 0   ;;  %vm428_vm2 = vcmask 261120   ;;  %vm590_vm3 = vcmask 130048  }
  0x27   : > { %981 = vmatprep.subr.bf16.mxu1 %v1197_v2  ;;  %973 = vmatprep.subr.bf16.mxu0 %v1197_v2  ;;  %v1091_v4 = vld [vmem:[%s387_s18] sm:$0xff]   ;;  %v1092_v5 = vld [vmem:[%s387_s18 + $0x8] sm:$0xff]   ;;  %vm637_vm4 = vcmask 64512   ;;  %vm653_vm5 = vcmask 1043456   ;;  %p948_p1 = scmp.ne.s32.totalorder %s1178_s27, 3 }
  0x28   : > { %982 = vmatpush3.bf16.msra.mxu1 %v1089_v1  ;;  %985 = vmatprep.mubr.msk.bf16.mxu1 %vm1198_vm1, %v1197_v2  ;;  %v411_v6 = vld [vmem:[%s382_s12] sm:$0xf]  ;;  %v1094_v20 = vld [vmem:[%s1335_s23 + $0x8] sm:$0xff]  }
  0x29   : > { %983 = vmatprep.subr.bf16.mxu1 %v1197_v2  ;;  %977 = vmatprep.mubr.msk.bf16.mxu0 %vm1198_vm1, %v1197_v2  ;;  %v410_v7 = vld [vmem:[%s1321_s10] sm:$0xf] }
  0x2a   : > { %974 = vmatpush3.bf16.msra.mxu0 %v1091_v4  ;;  %v1093_v19 = vld [vmem:[%s1335_s23] sm:$0xff]  }
  0x2b   : > { %975 = vmatprep.subr.bf16.mxu0 %v1197_v2  ;;  %v1095_v37 = vld [vmem:[%s1340_s15] sm:$0xff]  }
  0x2c   : > { %984 = vmatpush3.bf16.msra.mxu1 %v1090_v3  ;;  %v697_v47 = vld [vmem:[#allocation2] sm:$0xff] }
  0x2d   : > { %997 = vmatprep.subr.bf16.mxu1 %v1197_v2  ;;  %v949_v54 = vld [vmem:[%s1432_s6] ss:$0 sm:$0xff] (!%p948_p1) }
  0x2e   : > { %976 = vmatpush3.bf16.msra.mxu0 %v1092_v5 }
  0x2f   : > { %986 = vmatmul.mubr.msk.bf16.vlgmr.msra.gmra.mrb[0].mxu1 %vm428_vm2, %v411_v6  ;;  %989 = vmatprep.subr.bf16.mxu0 %v1197_v2 }
  0x30   : > { %999 = vmatprep.mubr.msk.bf16.mxu1 %vm1198_vm1, %v1197_v2 }
  0x31   : > { %978 = vmatmul.mubr.msk.bf16.vlgmr.msra.gmra.mrb[0].mxu0 %vm428_vm2, %v410_v7 }
  0x32   : > { %993 = vmatprep.mubr.msk.bf16.mxu0 %vm1198_vm1, %v1197_v2  ;;  %990 = vmatpush3.bf16.msra.mxu0 %v1093_v19 }
  0x33   : > { %991 = vmatprep.subr.bf16.mxu0 %v1197_v2 }
  0x36   : > { %992 = vmatpush3.bf16.msra.mxu0 %v1094_v20 }
  0x37   : > { %1003 = vmatprep.subr.bf16.mxu0 %v1197_v2 }
  0x39   : > { %994 = vmatmul.mubr.msk.bf16.vlgmr.msra.gmra.mrb[4].mxu0 %vm428_vm2, %v411_v6 }
  0x3a   : > { %1005 = vmatprep.mubr.msk.bf16.mxu0 %vm1198_vm1, %v1197_v2 }
 0x102   : > { %v526_v8 = vpop.f32.mrb[0].mxu1 }
 0x103   : > { %v532_v9 = vpack.c.bf16 %v526_v8, %v526_v8  ;;  %v987_v10 = vpop.f32.mrb[1].mxu1 }
 0x104   : > { %v529_v11 = vpop.f32.mrb[2].mxu1  ;;  %v466_v12 = vpop.f32.mrb[0].mxu0 }
 0x105   : > { %v595_v13 = vsel %vm590_vm3, %v532_v9, 0  ;;  %v988_v14 = vpop.f32.mrb[3].mxu1  ;;  %v979_v15 = vpop.f32.mrb[1].mxu0  ;;  %v472_v18 = vpack.c.bf16 %v466_v12, %v466_v12 }
 0x106   : > { %998 = vmatpush3.bf16.xpose.msra.mxu1 %v595_v13  ;;  %v469_v16 = vpop.f32.mrb[2].mxu0 }
 0x107   : > { %v980_v17 = vpop.f32.mrb[3].mxu0  ;;  %1009 = vmatprep.subr.bf16.mxu1 %v1197_v2 }
 0x10c   : > { %v583_v31 = vpop.f32.mrb[4].mxu0 }
 0x10d   : > { %1000 = vmatmul.mubr.msk.bf16.vlgmr.msra.gmra.mrb[4].mxu1 %vm590_vm3, %v472_v18  ;;  %v995_v32 = vpop.f32.mrb[5].mxu0  ;;  %v589_v35 = vpack.c.bf16 %v583_v31, %v583_v31 }
 0x10e   : > { %1011 = vmatprep.mubr.msk.bf16.mxu1 %vm1198_vm1, %v1197_v2  ;;  %v586_v33 = vpop.f32.mrb[6].mxu0  ;;  %1010 = vmatpush3.bf16.msra.mxu1 %v1095_v37 }
 0x10f   : > { %v996_v34 = vpop.f32.mrb[7].mxu0  ;;  %v655_v36 = vsel %vm653_vm5, %v589_v35, 0 }
 0x110   : > { %1004 = vmatpush3.bf16.msra.mxu0 %v655_v36 }
 0x1e0   : > { %v631_v21 = vpop.f32.mrb[4].mxu1 }
 0x1e1   : > { %v1001_v22 = vpop.f32.mrb[5].mxu1  ;;  %v638_v23 = vsel %vm637_vm4, %v631_v21, -inf }
 0x1e2   : > { %639 = vmax.xlane.f32.xlu0 %v638_v23  ;;  %v634_v24 = vpop.f32.mrb[6].mxu1 }
 0x1e3   : > { %v1002_v25 = vpop.f32.mrb[7].mxu1 }
 0x26f   : > { %v640_v26 = vpop.xlane.xlu0 %639 }
 0x270   : > { %v641_v27 = vsub.f32 %v631_v21, %v640_v26 }
 0x272   : > { %v642_v28 = vmul.f32 1.442695, %v641_v27 }
 0x274   : > { %1096 = vpow2.f32 %v642_v28 }
 0x27e   : > { %v1097_v29 = vpop.eup %1096 }
 0x27f   : > { %v644_v30 = vsel %vm637_vm4, %v1097_v29, 0.0 }
 0x280   : > { %645 = vadd.xlane.f32.xlu0 %v644_v30 }
 0x30d   : > { %v646_v38 = vpop.xlane.xlu0 %645 }
 0x30e   : > { %1098 = vrcp.f32 %v646_v38 }
 0x318   : > { %v1099_v39 = vpop.eup %1098 }
 0x319   : > { %v648_v40 = vmul.f32 %v1099_v39, %v1097_v29 }
 0x31b   : > { %v649_v41 = vpack.c.bf16 %v648_v40, %v648_v40 }
 0x31d   : > { %1006 = vmatmul.mubr.msk.bf16.vlgmr.msra.gmra.mrb[8].mxu0 %vm637_vm4, %v649_v41 }
 0x3f0   : > { %v691_v42 = vpop.f32.mrb[8].mxu0 }
 0x3f1   : > { %v698_v43 = vpack.c.bf16 %v691_v42, %v691_v42  ;;  %v1007_v44 = vpop.f32.mrb[9].mxu0 }
 0x3f2   : > { %v694_v45 = vpop.f32.mrb[10].mxu0 }
 0x3f3   : > { %v1008_v46 = vpop.f32.mrb[11].mxu0  ;;  %1012 = vmatmul.mubr.msk.bf16.vlgmr.msra.gmra.mrb[8].mxu1 %vm590_vm3, %v698_v43 }
 0x4c3   : > { %755 = sbr.rel (%p948_p1) target bundleno = 1236 (0x4d4), region = 56 }
 0x4c6   : > { %v744_v48 = vpop.f32.mrb[8].mxu1 }
 0x4c7   : > { %v750_v49 = vadd.f32 %v744_v48, %v697_v47  ;;  %v1013_v50 = vpop.f32.mrb[9].mxu1 }
 0x4c8   : > { %v747_v51 = vpop.f32.mrb[10].mxu1 }
 0x4c9   : > { %751 = vst.msk [vmem:[#allocation2] sm:$0xff] %vm428_vm2, %v750_v49  ;;  %v1014_v52 = vpop.f32.mrb[11].mxu1 }
 0x4d0   : > { %v756_v53 = vld [vmem:[#allocation2] sm:$0xff] }
 0x4d1   : > { %v764_v55 = vadd.f32 %v949_v54, %v756_v53 }
 0x4d3   : > { %765 = vst.msk [vmem:[%s371_s22] sm:$0xff] %vm428_vm2, %v764_v55 }
 0x4d4 PF: > { %s951_s26 = sshll.u32 %s1182_s28, 7  ;;  %s781_s8 = sshll.u32 %s371_s22, 4  ;;  %s782_s8 = int_to_ptr.vmem [resolvable:$true] %s781_s8 }
 0x4d5   : > { %s1375_s27 = scalar_lea.hbm %s1433_s7, %s951_s26  ;;  %s1456_s11 = sand.u32 1, %s1170_s25  }
 0x4d6   : > { %s767_s12 = scalar_lea.sflag [#allocation4], %s1456_s11  ;;  %s1100_s14 = scalar_lea.vmem %s782_s8, 128 }
 0x4d7   : > { %p1101_p2 = scmp.ne.s32.totalorder %s782_s8, %s1100_s14  ;;  %s1199_s17 = smov [#allocation3]  }
 0x4d8   : > { %s1104_s18 = sshll.u32 %s1199_s17, 4  ;;  %s1105_s18 = int_to_ptr.vmem [resolvable:$false] %s1104_s18 }
 0x4d9   : > { %p1102_p4 = pnand %p1101_p2, %p1289_p3  ;;  %s1106_s21 = scalar_lea.vmem %s1105_s18, 256 }
 0x4da   : > { %p1107_p6 = scmp.lt.s32.totalorder %s782_s8, %s1105_s18  ;;  %p1108_p7 = scmp.lt.s32.totalorder %s1106_s21, %s1100_s14 }
 0x4db   : > { %p1103_p5 = pneg %p1102_p4 }
 0x4dc   : > { %p1109_p8 = por %p1108_p7, %p1107_p6 }
 0x4de   : > { %p1110_p10 = pnand %p1109_p8, %p1103_p5 }
 0x4e0   : > { %1113 = shalt.err (!%p1110_p10)
}
 0x4e1   : > { %s1114_s28 = scalar_lea.hbm %s1375_s27, 128  ;;  %s1118_s16 = scalar_lea.hbm %s1433_s7, 256 }
 0x4e2   : > { %p1115_p11 = scmp.ne.s32.totalorder %s1375_s27, %s1114_s28  ;;  %p1119_p0 = scmp.lt.u32.totalorder %s1375_s27, %s1433_s7 }
 0x4e3   : > { %p1120_p1 = scmp.lt.u32.totalorder %s1118_s16, %s1114_s28  ;;  %p1122_p4 = scmp.lt.u32.totalorder %s1114_s28, %s1375_s27 }
 0x4e4   : > { %p1116_p12 = pnand %p1115_p11, %p1289_p3 }
 0x4e5   : > { %p1121_p2 = por %p1120_p1, %p1119_p0 }
 0x4e6   : > { %p1117_p13 = pneg %p1116_p12 }
 0x4e7   : > { %p1123_p5 = por %p1122_p4, %p1121_p2 }
 0x4e9   : > { %p1124_p6 = pnand %p1123_p5, %p1117_p13 }
 0x4eb   : > { %1127 = shalt.err (!%p1124_p6)
}
 0x4ec   : > { %1015 = dma.vmem_to_hbm [thread:$0]  (%p1289_p3), %s782_s8, 128, %s1375_s27, %s767_s12  }
 0x4ed PF: > { %s1457_s9 = sld [smem:[#allocation10_spill]]  ;;  %s1458_s15 = sld [smem:[#allocation6_spill]] }
 0x4f3   : > { %p1021_p7 = scmp.ge.s32.totalorder %s1457_s9, 2  ;;  %s793_s0 = sand.u32 1, %s1458_s15  }
 0x4f4   : > { %s794_s24 = scalar_lea.sflag [#allocation4], %s793_s0 }
 0x4f5   : > { %p1018_p8 = pnand %p1021_p7, %p1299_p9 }
 0x4f7   : > { %1161 = dma.done.wait (!%p1018_p8), %s794_s24, 128  }
 0x4f8   : > { %1163 = vsyncadd (!%p1018_p8), %s794_s24, 4294967168  ;;  %s20_s8 = sadd.s32 1, %s1457_s9   ;;  %s1460_s26 = sld [smem:[#allocation7_spill]] }
 0x4f9   : > { %p17_p10 = scmp.ge.s32.totalorder %s20_s8, 10   ;;  %s1461_s29 = sld [smem:[#allocation14_spill]] }
 0x4fa   : > { %s1462_s27 = sld [smem:[#allocation8_spill]]  ;;  %s1463_s28 = sld [smem:[#allocation9_spill]] }
 0x4fb   : > { %s1464_s13 = sld [smem:[#allocation11_spill]]  ;;  %s1465_s30 = sld [smem:[#allocation12_spill]] }
 0x4fc   : > { %s1466_s24 = smov %s1170_s25  ;;  %19 = sbr.rel (!%p17_p10) target bundleno = 7 (0x7), region = 106 }
 0x4fe   : > { %s1467_s25 = smov %s1460_s26 }
 0x4ff   : > { %s1468_s26 = smov %s1461_s29 }
 0x501   : > { %s1469_s29 = smov %s1464_s13 }
 0x503   :  { %799 = vsyncpa [#allocation4], 1 }
 0x504   :  { %801 = vsyncpa [#allocation4 + $0x1], 1 }

</bundles_post_ra>
